<compile_context>
chip_gen: v7x
topology: tpu7x:2x2x1
jax: 0.10.0
libtpu: 0.0.40
codegen_flags: <defaults>
</compile_context>

<pallas_src>
import jax
import jax.numpy as jnp
from jax.experimental import pallas as pl
from jax.experimental.pallas import tpu as pltpu


def rbfnn_kernel(xy_ref, w1_ref, b1_ref, w2_ref, b2_ref, w3_ref, b3_ref, o_ref):
    # xy_ref: (2, TN)   -- row 0 = x, row 1 = y, points on the lane axis
    # w1_ref: (K, 1), b1_ref: (K, 1)
    # w2_ref: (K, K),  b2_ref: (K, 1)
    # w3_ref: (1, K),  b3_ref: (1, 1) scalar in SMEM
    # o_ref : (1, TN)
    x = xy_ref[0:1, :]                                   # (1, TN)
    y = xy_ref[1:2, :]                                   # (1, TN)
    r = x * x + y * y                                    # (1, TN)

    # layer1: input feature dim is 1 -> broadcast multiply on the VPU
    # (K,1)*(1,TN) + (K,1) keeps all 128 lanes live per vreg.
    h1 = jnp.tanh(w1_ref[...] * r + b1_ref[...])         # (K, TN)

    # layer2: real MXU matmul, f32 accumulate, TN-wide output fills the lanes.
    h2 = jnp.tanh(
        jnp.dot(w2_ref[...], h1, preferred_element_type=jnp.float32)
        + b2_ref[...])                                   # (K, TN)

    # layer3: project to a scalar per point -> lane-dense (1, TN) row,
    # stored directly (no (TM,1)->(TM,) relayout).
    out = (jnp.dot(w3_ref[...], h2, preferred_element_type=jnp.float32)
           + b3_ref[0, 0])                               # (1, TN)
    o_ref[...] = out


def rbfnn_forward(x, y, params, *, max_tile=4096):
    """Pallas implementation of RBFNNKernel.forward(x, y)."""
    assert x.shape == y.shape
    orig_shape = x.shape
    xf = x.reshape(-1).astype(jnp.float32)
    yf = y.reshape(-1).astype(jnp.float32)
    n = xf.shape[0]

    w1, b1, w2, b2, w3, b3 = params
    k = w2.shape[0]

    # Lane tile: multiple of 128; one grid step when the whole array fits.
    assert max_tile % 128 == 0
    if n <= max_tile:
        tn = ((n + 127) // 128) * 128
    else:
        tn = max_tile
    n_pad = ((n + tn - 1) // tn) * tn
    if n_pad != n:
        xf = jnp.pad(xf, (0, n_pad - n))
        yf = jnp.pad(yf, (0, n_pad - n))

    # Stack x and y -> one input DMA per grid step.
    xy = jnp.stack([xf, yf], axis=0)                     # (2, n_pad)

    grid = (n_pad // tn,)
    resident = lambda i: (0, 0)                          # weights stay put

    out = pl.pallas_call(
        rbfnn_kernel,
        out_shape=jax.ShapeDtypeStruct((1, n_pad), jnp.float32),
        grid_spec=pl.GridSpec(
            grid=grid,
            in_specs=[
                pl.BlockSpec((2, tn), lambda i: (0, i)),          # xy tile
                pl.BlockSpec((k, 1), resident),                   # W1
                pl.BlockSpec((k, 1), resident),                   # b1
                pl.BlockSpec((k, k), resident),                   # W2
                pl.BlockSpec((k, 1), resident),                   # b2
                pl.BlockSpec((1, k), resident),                   # W3
                pl.BlockSpec(memory_space=pltpu.MemorySpace.SMEM),  # b3 scalar
            ],
            out_specs=pl.BlockSpec((1, tn), lambda i: (0, i)),
        ),
        compiler_params=pltpu.CompilerParams(
            # "parallel" lets v7x shard point tiles across its two TCs; VMEM
            # use per step (~K*TN*4 B intermediates) is far below the default
            # scoped limit on every generation, so no vmem_limit override.
            dimension_semantics=("parallel",)),
    )(xy, w1, b1, w2, b2, w3, b3)

    return out.reshape(-1)[:n].reshape(orig_shape)


def init_params(key, n_kernel):
    """Deterministic init mirroring nn.Linear shapes (out_features, in_features):
       layer1: (K,1)+(K,), layer2: (K,K)+(K,), layer3: (1,K)+(1,).
       Stored exactly in the (K-major) orientation the transposed kernel uses."""
    k1, k2, k3, k4, k5, k6 = jax.random.split(key, 6)
    K = n_kernel
    w1 = jax.random.uniform(k1, (K, 1), jnp.float32, -1.0, 1.0)
    b1 = jax.random.uniform(k2, (K, 1), jnp.float32, -1.0, 1.0)
    w2 = jax.random.uniform(k3, (K, K), jnp.float32, -1.0, 1.0) / jnp.sqrt(K)
    b2 = jax.random.uniform(k4, (K, 1), jnp.float32, -1.0, 1.0) / jnp.sqrt(K)
    w3 = jax.random.uniform(k5, (1, K), jnp.float32, -1.0, 1.0) / jnp.sqrt(K)
    b3 = jax.random.uniform(k6, (1, 1), jnp.float32, -1.0, 1.0)
    return (w1, b1, w2, b2, w3, b3)


def rbfnn_reference(x, y, params):
    """Pure-JAX reference matching the PyTorch forward semantics."""
    w1, b1, w2, b2, w3, b3 = params
    r = x * x + y * y
    orig_shape = r.shape
    rr = r.reshape(-1, 1)
    h1 = jnp.tanh(rr @ w1.T + b1.T)       # (N, K)
    h2 = jnp.tanh(h1 @ w2.T + b2.T)       # (N, K)
    out = h2 @ w3.T + b3                  # (N, 1)
    return out.reshape(orig_shape)


if __name__ == "__main__":
    n_kernel = 32
    key = jax.random.PRNGKey(0)
    kx, ky, kp = jax.random.split(key, 3)

    # small deterministic inputs: batch=2, spatial 16x16 -> 512 flattened points
    shape = (2, 16, 16)
    x = jax.random.normal(kx, shape, jnp.float32)
    y = jax.random.normal(ky, shape, jnp.float32)

    params = init_params(kp, n_kernel)

    out = rbfnn_forward(x, y, params)
    out = jax.block_until_ready(out)

    ref = rbfnn_reference(x, y, params)
    assert out.shape == shape
    assert jnp.allclose(out, ref, atol=1e-5, rtol=1e-5), "mismatch vs reference"

    print("KERNEL_OK")
</pallas_src>

<mosaic_0001>
module attributes {stable_mosaic.version = 11 : i64} {
  func.func @rbfnn_kernel(%arg0: i32, %arg1: memref<2x512xf32, #tpu.memory_space<vmem>>, %arg2: memref<32x1xf32, #tpu.memory_space<vmem>>, %arg3: memref<32x1xf32, #tpu.memory_space<vmem>>, %arg4: memref<32x32xf32, #tpu.memory_space<vmem>>, %arg5: memref<32x1xf32, #tpu.memory_space<vmem>>, %arg6: memref<1x32xf32, #tpu.memory_space<vmem>>, %arg7: memref<1x1xf32, #tpu.memory_space<smem>>, %arg8: memref<1x512xf32, #tpu.memory_space<vmem>>) attributes {dimension_semantics = [#tpu.dimension_semantics<parallel>], iteration_bounds = array<i64: 1>, scalar_prefetch = 0 : i64, scratch_operands = 0 : i64, tpu.core_type = #tpu.core_type<tc>, window_params = [{transform_indices = @transform_0, window_bounds = array<i64: 2, 512>}, {pipeline_mode = #tpu.pipeline_mode<synchronous>, transform_indices = @transform_1, window_bounds = array<i64: 32, 1>}, {pipeline_mode = #tpu.pipeline_mode<synchronous>, transform_indices = @transform_2, window_bounds = array<i64: 32, 1>}, {pipeline_mode = #tpu.pipeline_mode<synchronous>, transform_indices = @transform_3, window_bounds = array<i64: 32, 32>}, {pipeline_mode = #tpu.pipeline_mode<synchronous>, transform_indices = @transform_4, window_bounds = array<i64: 32, 1>}, {pipeline_mode = #tpu.pipeline_mode<synchronous>, transform_indices = @transform_5, window_bounds = array<i64: 1, 32>}, {transform_indices = @transform_6, window_bounds = array<i64: 1, 1>}, {transform_indices = @transform_7, window_bounds = array<i64: 1, 512>}]} {
    %c0 = arith.constant 0 : index
    %c0_0 = arith.constant 0 : index
    %0 = vector.load %arg1[%c0, %c0_0] : memref<2x512xf32, #tpu.memory_space<vmem>>, vector<1x512xf32>
    %c1 = arith.constant 1 : index
    %c0_1 = arith.constant 0 : index
    %1 = vector.load %arg1[%c1, %c0_1] : memref<2x512xf32, #tpu.memory_space<vmem>>, vector<1x512xf32>
    %2 = arith.mulf %0, %0 : vector<1x512xf32>
    %3 = arith.mulf %1, %1 : vector<1x512xf32>
    %4 = arith.addf %2, %3 : vector<1x512xf32>
    %c0_2 = arith.constant 0 : index
    %c0_3 = arith.constant 0 : index
    %5 = vector.load %arg2[%c0_2, %c0_3] : memref<32x1xf32, #tpu.memory_space<vmem>>, vector<32x1xf32>
    %6 = vector.broadcast %5 : vector<32x1xf32> to vector<32x512xf32>
    %7 = vector.broadcast %4 : vector<1x512xf32> to vector<32x512xf32>
    %8 = arith.mulf %6, %7 : vector<32x512xf32>
    %c0_4 = arith.constant 0 : index
    %c0_5 = arith.constant 0 : index
    %9 = vector.load %arg3[%c0_4, %c0_5] : memref<32x1xf32, #tpu.memory_space<vmem>>, vector<32x1xf32>
    %10 = vector.broadcast %9 : vector<32x1xf32> to vector<32x512xf32>
    %11 = arith.addf %8, %10 : vector<32x512xf32>
    %12 = math.tanh %11 : vector<32x512xf32>
    %c0_6 = arith.constant 0 : index
    %c0_7 = arith.constant 0 : index
    %13 = vector.load %arg4[%c0_6, %c0_7] : memref<32x32xf32, #tpu.memory_space<vmem>>, vector<32x32xf32>
    %cst = arith.constant dense<0.000000e+00> : vector<32x512xf32>
    %14 = tpu.matmul %13, %12, %cst {dimension_numbers = #tpu.dot_dimension_numbers<[1], [0], [0], [1], [0, 0, 1, 1], [], []>} : vector<32x32xf32>, vector<32x512xf32>, vector<32x512xf32> -> vector<32x512xf32>
    %c0_8 = arith.constant 0 : index
    %c0_9 = arith.constant 0 : index
    %15 = vector.load %arg5[%c0_8, %c0_9] : memref<32x1xf32, #tpu.memory_space<vmem>>, vector<32x1xf32>
    %16 = vector.broadcast %15 : vector<32x1xf32> to vector<32x512xf32>
    %17 = arith.addf %14, %16 : vector<32x512xf32>
    %18 = math.tanh %17 : vector<32x512xf32>
    %c0_10 = arith.constant 0 : index
    %c0_11 = arith.constant 0 : index
    %19 = vector.load %arg6[%c0_10, %c0_11] : memref<1x32xf32, #tpu.memory_space<vmem>>, vector<1x32xf32>
    %cst_12 = arith.constant dense<0.000000e+00> : vector<1x512xf32>
    %20 = tpu.matmul %19, %18, %cst_12 {dimension_numbers = #tpu.dot_dimension_numbers<[1], [0], [0], [1], [0, 0, 1, 1], [], []>} : vector<1x32xf32>, vector<32x512xf32>, vector<1x512xf32> -> vector<1x512xf32>
    %c0_13 = arith.constant 0 : index
    %c0_14 = arith.constant 0 : index
    %21 = memref.load %arg7[%c0_13, %c0_14] : memref<1x1xf32, #tpu.memory_space<smem>>
    %22 = vector.broadcast %21 : f32 to vector<1x512xf32>
    %23 = arith.addf %20, %22 : vector<1x512xf32>
    %c0_15 = arith.constant 0 : index
    %c0_16 = arith.constant 0 : index
    %24 = vector.load %arg8[%c0_15, %c0_16] : memref<1x512xf32, #tpu.memory_space<vmem>>, vector<1x512xf32>
    tpu.vector_store %arg8[%c0_15, %c0_16], %23 {strides = array<i32>} : memref<1x512xf32, #tpu.memory_space<vmem>>, vector<1x512xf32>,
    return
  }
  func.func @transform_0(%arg0: i32) -> (i32, i32) {
    %c0_i32 = arith.constant 0 : i32
    %c0_i32_0 = arith.constant 0 : i32
    return %c0_i32, %arg0 : i32, i32
  }
  func.func @transform_1(%arg0: i32) -> (i32, i32) {
    %c0_i32 = arith.constant 0 : i32
    %c0_i32_0 = arith.constant 0 : i32
    %c0_i32_1 = arith.constant 0 : i32
    return %c0_i32, %c0_i32_0 : i32, i32
  }
  func.func @transform_2(%arg0: i32) -> (i32, i32) {
    %c0_i32 = arith.constant 0 : i32
    %c0_i32_0 = arith.constant 0 : i32
    %c0_i32_1 = arith.constant 0 : i32
    return %c0_i32, %c0_i32_0 : i32, i32
  }
  func.func @transform_3(%arg0: i32) -> (i32, i32) {
    %c0_i32 = arith.constant 0 : i32
    %c0_i32_0 = arith.constant 0 : i32
    %c0_i32_1 = arith.constant 0 : i32
    return %c0_i32, %c0_i32_0 : i32, i32
  }
  func.func @transform_4(%arg0: i32) -> (i32, i32) {
    %c0_i32 = arith.constant 0 : i32
    %c0_i32_0 = arith.constant 0 : i32
    %c0_i32_1 = arith.constant 0 : i32
    return %c0_i32, %c0_i32_0 : i32, i32
  }
  func.func @transform_5(%arg0: i32) -> (i32, i32) {
    %c0_i32 = arith.constant 0 : i32
    %c0_i32_0 = arith.constant 0 : i32
    %c0_i32_1 = arith.constant 0 : i32
    return %c0_i32, %c0_i32_0 : i32, i32
  }
  func.func @transform_6(%arg0: i32) -> (i32, i32) {
    %c0_i32 = arith.constant 0 : i32
    %c0_i32_0 = arith.constant 0 : i32
    %c0_i32_1 = arith.constant 0 : i32
    return %c0_i32, %c0_i32_0 : i32, i32
  }
  func.func @transform_7(%arg0: i32) -> (i32, i32) {
    %c0_i32 = arith.constant 0 : i32
    %c0_i32_0 = arith.constant 0 : i32
    return %c0_i32, %arg0 : i32, i32
  }
}

</mosaic_0001>

<bundles_post_ra>
// kernel: tpu_custom_call.1
= control target key start
LH: loop header
LB: loop body
LE: loop exit
PB: predicated region body
PF: predicated region fallthrough
CT: control target
= control target key end

     0   :  { %v719_v2 = vmov 0   ;;  %s864_s0 = inlined_call_operand.vmem [shape: f32[2,512], index: 0, kind: input, shape index: {}]   ;;  %s865_s1 = inlined_call_operand.vmem [shape: f32[32,1], index: 1, kind: input, shape index: {}]   ;;  %s866_s2 = inlined_call_operand.vmem [shape: f32[32,1], index: 2, kind: input, shape index: {}]   ;;  %s867_s3 = inlined_call_operand.vmem [shape: f32[32,32], index: 3, kind: input, shape index: {}]   ;;  %s868_s4 = inlined_call_operand.vmem [shape: f32[32,1], index: 4, kind: input, shape index: {}]   ;;  %s869_s5 = inlined_call_operand.vmem [shape: f32[1,32], index: 5, kind: input, shape index: {}]   ;;  %s870_s6 = inlined_call_operand.<no memory space> [shape: f32[1,1], index: 6, kind: input, shape index: {}]   ;;  %s871_s7 = inlined_call_operand.hbm [shape: f32[1,512], index: 7, kind: output, shape index: {}]  }
   0x1   :  { %v95_v0 = vld [vmem:[%s866_s2] sm:$0xff]  ;;  %630 = vset.pattern.permute.xlu1 %v719_v2  ;;  %629 = vset.pattern.permute.xlu0 %v719_v2  ;;  %v96_v3 = vld [vmem:[%s866_s2 + $0x8] sm:$0xff] }
   0x2   :  { %v34_v1 = vld [vmem:[%s865_s1] sm:$0xff]  ;;  %101 = vperm.xlu1 %630, %v95_v0   ;;  %v35_v4 = vld [vmem:[%s865_s1 + $0x8] sm:$0xff] }
   0x3   :  { %40 = vperm.xlu0 %629, %v34_v1  }
   0x4   :  { %13 = vsyncpa [#allocation4], 0  ;;  %v37_v5 = vld [vmem:[%s865_s1 + $0x18] sm:$0xff]  ;;  %v36_v6 = vld [vmem:[%s865_s1 + $0x10] sm:$0xff]  ;;  %v720_v13 = vmov 0.0   ;;  %v59_v14 = vlaneseq  ;;  %vm179_vm0 = vcmask 261120  }
   0x5   :  { %v98_v7 = vld [vmem:[%s866_s2 + $0x18] sm:$0xff]  ;;  %v97_v8 = vld [vmem:[%s866_s2 + $0x10] sm:$0xff]  ;;  %v156_v9 = vld [vmem:[%s868_s4 + $0x8] sm:$0xff]  ;;  %256 = vmatprep.mubr.f32.mxu0 %v720_v13  ;;  %345 = vmatprep.mubr.f32.mxu1 %v720_v13 }
   0x6   :  { %106 = vperm.xlu1 %630, %v96_v3   ;;  %v155_v10 = vld [vmem:[%s868_s4] sm:$0xff]  ;;  %v158_v11 = vld [vmem:[%s868_s4 + $0x18] sm:$0xff]  ;;  %v157_v12 = vld [vmem:[%s868_s4 + $0x10] sm:$0xff]  ;;  %v808_v17 = vshrl.u32 %v59_v14, 7  ;;  %vm565_vm1 = vcmp.lt.s32.totalorder %v59_v14, 512 }
   0x7   :  { %45 = vperm.xlu0 %629, %v35_v4   ;;  %v28_v15 = vld [vmem:[%s864_s0] ss:$2 sm:$0xf]  ;;  %v582_v16 = vld [vmem:[%s864_s0 + $0x1] ss:$2 sm:$0xf] }
   0x8   :  { %v31_v18 = vmul.f32 %v28_v15, %v28_v15  ;;  %v32_v19 = vmul.f32 %v582_v16, %v582_v16  ;;  %v61_v20 = vsub.s32 0, %v808_v17  ;;  %v65_v21 = vsub.s32 1, %v808_v17 }
   0x9   :  { %v69_v22 = vsub.s32 2, %v808_v17  ;;  %v73_v23 = vsub.s32 3, %v808_v17 }
   0xa   :  { %55 = vperm.xlu1 %630, %v37_v5   ;;  %v33_v24 = vadd.f32 %v32_v19, %v31_v18 }
   0xb   :  { %50 = vperm.xlu0 %629, %v36_v6  }
   0xc   :  { %v62_v25 = vrot.slane %v33_v24, %v61_v20  ;;  %v66_v26 = vrot.slane %v33_v24, %v65_v21  ;;  %v70_v27 = vrot.slane %v33_v24, %v69_v22  ;;  %v74_v28 = vrot.slane %v33_v24, %v73_v23 }
   0xe   :  { %116 = vperm.xlu1 %630, %v98_v7  }
   0xf   :  { %111 = vperm.xlu0 %629, %v97_v8  }
  0x12   :  { %166 = vperm.xlu1 %630, %v156_v9  }
  0x13   :  { %161 = vperm.xlu0 %629, %v155_v10  }
  0x16   :  { %176 = vperm.xlu1 %630, %v158_v11  }
  0x17   :  { %171 = vperm.xlu0 %629, %v157_v12  }
  0x81   :  { %v102_v29 = vpop.permute.xlu1 %101 }
  0x82   :  { %v41_v30 = vpop.permute.xlu0 %40 }
  0x83   :  { %v79_v31 = vmul.f32 %v62_v25, %v41_v30  ;;  %v80_v32 = vmul.f32 %v66_v26, %v41_v30  ;;  %v81_v33 = vmul.f32 %v70_v27, %v41_v30  ;;  %v82_v34 = vmul.f32 %v74_v28, %v41_v30 }
  0x85   :  { %v119_v35 = vadd.f32 %v102_v29, %v79_v31  ;;  %v120_v36 = vadd.f32 %v102_v29, %v80_v32  ;;  %v121_v37 = vadd.f32 %v102_v29, %v81_v33  ;;  %v122_v38 = vadd.f32 %v102_v29, %v82_v34  ;;  %v107_v39 = vpop.permute.xlu1 %106  ;;  %v151_v32 = vld [vmem:[%s867_s3] sm:$0xff]  ;;  %v152_v33 = vld [vmem:[%s867_s3 + $0x8] sm:$0xff]  ;;  %v153_v34 = vld [vmem:[%s867_s3 + $0x10] sm:$0xff] }
  0x86   :  { %v46_v40 = vpop.permute.xlu0 %45 }
  0x87   :  { %631 = vtanh.f32 %v119_v35  ;;  %v83_v41 = vmul.f32 %v62_v25, %v46_v40  ;;  %v84_v42 = vmul.f32 %v66_v26, %v46_v40  ;;  %v85_v43 = vmul.f32 %v70_v27, %v46_v40  ;;  %v154_v35 = vld [vmem:[%s867_s3 + $0x18] sm:$0xff] }
  0x88   :  { %633 = vtanh.f32 %v120_v36  ;;  %v86_v44 = vmul.f32 %v74_v28, %v46_v40 }
  0x89   :  { %635 = vtanh.f32 %v121_v37  ;;  %v123_v45 = vadd.f32 %v107_v39, %v83_v41  ;;  %v124_v46 = vadd.f32 %v107_v39, %v84_v42  ;;  %v125_v47 = vadd.f32 %v107_v39, %v85_v43  ;;  %v56_v49 = vpop.permute.xlu1 %55 }
  0x8a   :  { %637 = vtanh.f32 %v122_v38  ;;  %v126_v48 = vadd.f32 %v107_v39, %v86_v44  ;;  %v51_v50 = vpop.permute.xlu0 %50  ;;  %v91_v51 = vmul.f32 %v62_v25, %v56_v49  ;;  %v92_v52 = vmul.f32 %v66_v26, %v56_v49 }
  0x8b   :  { %639 = vtanh.f32 %v123_v45  ;;  %v93_v53 = vmul.f32 %v70_v27, %v56_v49  ;;  %v94_v54 = vmul.f32 %v74_v28, %v56_v49  ;;  %v87_v57 = vmul.f32 %v62_v25, %v51_v50 }
  0x8c   :  { %641 = vtanh.f32 %v124_v46  ;;  %v88_v61 = vmul.f32 %v66_v26, %v51_v50  ;;  %v89_v0 = vmul.f32 %v70_v27, %v51_v50  ;;  %v90_v3 = vmul.f32 %v74_v28, %v51_v50 }
  0x8d   :  { %643 = vtanh.f32 %v125_v47  ;;  %v117_v55 = vpop.permute.xlu1 %116 }
  0x8e   :  { %645 = vtanh.f32 %v126_v48  ;;  %v112_v56 = vpop.permute.xlu0 %111  ;;  %v131_v58 = vadd.f32 %v117_v55, %v91_v51  ;;  %v132_v59 = vadd.f32 %v117_v55, %v92_v52  ;;  %v133_v60 = vadd.f32 %v117_v55, %v93_v53 }
  0x8f   :  { %v134_v62 = vadd.f32 %v117_v55, %v94_v54  ;;  %v127_v1 = vadd.f32 %v112_v56, %v87_v57  ;;  %v128_v4 = vadd.f32 %v112_v56, %v88_v61  ;;  %v129_v6 = vadd.f32 %v112_v56, %v89_v0 }
  0x90   :  { %647 = vtanh.f32 %v131_v58  ;;  %v130_v8 = vadd.f32 %v112_v56, %v90_v3 }
  0x91   :  { %v632_v63 = vpop.eup %631  ;;  %649 = vtanh.f32 %v132_v59  ;;  %v167_v44 = vpop.permute.xlu1 %166 }
  0x92   :  { %v634_v2 = vpop.eup %633  ;;  %651 = vtanh.f32 %v133_v60  ;;  %v162_v36 = vpop.permute.xlu0 %161 }
  0x93   :  { %v636_v5 = vpop.eup %635  ;;  %653 = vtanh.f32 %v134_v62 }
  0x94   :  { %v638_v7 = vpop.eup %637  ;;  %655 = vtanh.f32 %v127_v1 }
  0x95   :  { %v640_v9 = vpop.eup %639  ;;  %657 = vtanh.f32 %v128_v4  ;;  %v177_v61 = vpop.permute.xlu1 %176 }
  0x96   :  { %v642_v10 = vpop.eup %641  ;;  %v595_v11 = vpack.c.bf16 %v640_v9, %v632_v63  ;;  %659 = vtanh.f32 %v129_v6  ;;  %v172_v52 = vpop.permute.xlu0 %171 }
  0x97   :  { %v644_v12 = vpop.eup %643  ;;  %v593_v15 = vpack.c.bf16 %v642_v10, %v634_v2  ;;  %661 = vtanh.f32 %v130_v8 }
  0x98   :  { %v646_v16 = vpop.eup %645  ;;  %v603_v18 = vpack.c.bf16 %v644_v12, %v636_v5 }
  0x99   :  { %594 = vmatprep.subr.bf16.mxu0 %v593_v15  ;;  %v601_v19 = vpack.c.bf16 %v646_v16, %v638_v7 }
  0x9a   :  { %596 = vmatpush1.bf16.msra.mxu0 %v595_v11  ;;  %v648_v20 = vpop.eup %647 }
  0x9b   :  { %602 = vmatprep.subr.bf16.mxu1 %v601_v19  ;;  %v650_v21 = vpop.eup %649 }
  0x9c   :  { %604 = vmatpush1.bf16.msra.mxu1 %v603_v18  ;;  %v652_v22 = vpop.eup %651 }
  0x9d   :  { %v654_v23 = vpop.eup %653 }
  0x9e   :  { %v656_v24 = vpop.eup %655 }
  0x9f   :  { %v658_v25 = vpop.eup %657  ;;  %v599_v26 = vpack.c.bf16 %v648_v20, %v656_v24 }
  0xa0   :  { %v660_v27 = vpop.eup %659  ;;  %v597_v28 = vpack.c.bf16 %v650_v21, %v658_v25 }
  0xa1   :  { %v662_v29 = vpop.eup %661  ;;  %v607_v30 = vpack.c.bf16 %v652_v22, %v660_v27 }
  0xa2   :  { %598 = vmatprep.subr.bf16.mxu0 %v597_v28  ;;  %v605_v31 = vpack.c.bf16 %v654_v23, %v662_v29 }
  0xa3   :  { %600 = vmatpush1.bf16.msra.mxu0 %v599_v26 }
  0xa4   :  { %606 = vmatprep.subr.bf16.mxu1 %v605_v31 }
  0xa5   :  { %608 = vmatpush1.bf16.msra.mxu1 %v607_v30 }
  0xa6   :  { %583 = vmatmul.mubr.msk.f32.vlgmr.msra.gmra.mrb[0].mxu0 %vm179_vm0, %v151_v32 }
  0xa7   :  { %262 = vmatprep.mubr.f32.mxu0 %v720_v13 }
  0xa8   :  { %587 = vmatmul.mubr.msk.f32.vlgmr.msra.gmra.mrb[0].mxu1 %vm179_vm0, %v151_v32 }
  0xa9   :  { %351 = vmatprep.mubr.f32.mxu1 %v720_v13 }
  0xaa   :  { %584 = vmatmul.mubr.msk.f32.gmra.mrb[2].mxu0 %vm179_vm0, %v152_v33 }
  0xab   :  { %268 = vmatprep.mubr.f32.mxu0 %v720_v13 }
  0xac   :  { %588 = vmatmul.mubr.msk.f32.gmra.mrb[2].mxu1 %vm179_vm0, %v152_v33 }
  0xad   :  { %357 = vmatprep.mubr.f32.mxu1 %v720_v13 }
  0xae   :  { %585 = vmatmul.mubr.msk.f32.gmra.mrb[4].mxu0 %vm179_vm0, %v153_v34 }
  0xaf   :  { %274 = vmatprep.mubr.f32.mxu0 %v720_v13 }
  0xb0   :  { %589 = vmatmul.mubr.msk.f32.gmra.mrb[4].mxu1 %vm179_vm0, %v153_v34  ;;  %v386_v34 = vld [vmem:[%s869_s5] sm:$0x1]  ;;  %s722_s5 = smov [#allocation3]  }
  0xb1   :  { %363 = vmatprep.mubr.f32.mxu1 %v720_v13  ;;  %s574_s13 = sshll.u32 %s722_s5, 4  ;;  %s575_s13 = int_to_ptr.vmem [resolvable:$true] %s574_s13 }
  0xb2   :  { %586 = vmatmul.mubr.msk.f32.gmra.mrb[6].mxu0 %vm179_vm0, %v154_v35  ;;  %p700_p1 = scmp.lt.s32.totalorder %s575_s13, %s575_s13 }
  0xb3   :  { %456 = vmatprep.mubr.f32.mxu0 %v720_v13 }
  0xb4   :  { %590 = vmatmul.mubr.msk.f32.gmra.mrb[6].mxu1 %vm179_vm0, %v154_v35  ;;  %v721_v35 = vmov 1966171168  }
  0xb5   :  { %527 = vmatprep.mubr.f32.mxu1 %v720_v13 }
 0x179   :  { %v258_v37 = vpop.f32.mrb[0].mxu0 }
 0x17a   :  { %v259_v38 = vadd.f32 %v258_v37, %v162_v36  ;;  %v260_v39 = vpop.f32.mrb[1].mxu0  ;;  %v388_v37 = vstv %s870_s6  ;;  %s695_s6 = scalar_lea.vmem %s575_s13, 64 }
 0x17b   :  { %v347_v40 = vpop.f32.mrb[0].mxu1  ;;  %v261_v41 = vadd.f32 %v260_v39, %v162_v36  ;;  %p696_p0 = scmp.ne.s32.totalorder %s575_s13, %s695_s6  ;;  %p701_p2 = scmp.lt.s32.totalorder %s695_s6, %s695_s6 }
 0x17c   :  { %663 = vtanh.f32 %v259_v38  ;;  %v348_v42 = vadd.f32 %v347_v40, %v162_v36  ;;  %v349_v43 = vpop.f32.mrb[1].mxu1 }
 0x17d   :  { %665 = vtanh.f32 %v261_v41  ;;  %v350_v45 = vadd.f32 %v349_v43, %v162_v36  ;;  %v264_v46 = vpop.f32.mrb[2].mxu0  ;;  %v541_v36 = vunpack.c.l.s4 %v721_v35  ;;  %p702_p3 = por %p701_p2, %p700_p1 }
 0x17e   :  { %667 = vtanh.f32 %v348_v42  ;;  %v265_v47 = vadd.f32 %v264_v46, %v167_v44  ;;  %v266_v48 = vpop.f32.mrb[3].mxu0 }
 0x17f   :  { %669 = vtanh.f32 %v350_v45  ;;  %v353_v49 = vpop.f32.mrb[2].mxu1  ;;  %v267_v50 = vadd.f32 %v266_v48, %v167_v44  ;;  %v542_v38 = vunpack.c.0.s8 %v541_v36  ;;  %p703_p4 = pnand %p702_p3, %p696_p0 }
 0x180   :  { %671 = vtanh.f32 %v265_v47  ;;  %v354_v13 = vadd.f32 %v353_v49, %v167_v44  ;;  %v355_v51 = vpop.f32.mrb[3].mxu1 }
 0x181   :  { %673 = vtanh.f32 %v267_v50  ;;  %v356_v53 = vadd.f32 %v355_v51, %v167_v44  ;;  %v270_v54 = vpop.f32.mrb[4].mxu0  ;;  %v545_v44 = vsub.s32 %v542_v38, %v808_v17 }
 0x182   :  { %675 = vtanh.f32 %v354_v13  ;;  %v271_v55 = vadd.f32 %v270_v54, %v172_v52  ;;  %v272_v56 = vpop.f32.mrb[5].mxu0 }
 0x183   :  { %677 = vtanh.f32 %v356_v53  ;;  %v359_v57 = vpop.f32.mrb[4].mxu1  ;;  %v273_v58 = vadd.f32 %v272_v56, %v172_v52 }
 0x184   :  { %679 = vtanh.f32 %v271_v55  ;;  %v360_v59 = vadd.f32 %v359_v57, %v172_v52  ;;  %v361_v60 = vpop.f32.mrb[5].mxu1 }
 0x185   :  { %681 = vtanh.f32 %v273_v58  ;;  %v362_v62 = vadd.f32 %v361_v60, %v172_v52  ;;  %v276_v63 = vpop.f32.mrb[6].mxu0 }
 0x186   :  { %v664_v0 = vpop.eup %663  ;;  %683 = vtanh.f32 %v360_v59  ;;  %v277_v1 = vadd.f32 %v276_v63, %v177_v61  ;;  %v278_v2 = vpop.f32.mrb[7].mxu0 }
 0x187   :  { %v666_v3 = vpop.eup %665  ;;  %685 = vtanh.f32 %v362_v62  ;;  %v365_v4 = vpop.f32.mrb[6].mxu1  ;;  %v279_v5 = vadd.f32 %v278_v2, %v177_v61 }
 0x188   :  { %v668_v6 = vpop.eup %667  ;;  %687 = vtanh.f32 %v277_v1  ;;  %v366_v7 = vadd.f32 %v365_v4, %v177_v61  ;;  %v367_v8 = vpop.f32.mrb[7].mxu1 }
 0x189   :  { %v670_v9 = vpop.eup %669  ;;  %689 = vtanh.f32 %v279_v5  ;;  %v368_v10 = vadd.f32 %v367_v8, %v177_v61 }
 0x18a   :  { %v672_v11 = vpop.eup %671  ;;  %691 = vtanh.f32 %v366_v7 }
 0x18b   :  { %v674_v12 = vpop.eup %673  ;;  %693 = vtanh.f32 %v368_v10  ;;  %v611_v15 = vpack.c.bf16 %v672_v11, %v664_v0 }
 0x18c   :  { %v676_v16 = vpop.eup %675  ;;  %v609_v18 = vpack.c.bf16 %v674_v12, %v666_v3 }
 0x18d   :  { %v678_v19 = vpop.eup %677  ;;  %v619_v20 = vpack.c.bf16 %v676_v16, %v668_v6 }
 0x18e   :  { %v680_v21 = vpop.eup %679  ;;  %610 = vmatprep.subr.bf16.mxu0 %v609_v18  ;;  %v617_v22 = vpack.c.bf16 %v678_v19, %v670_v9 }
 0x18f   :  { %v682_v23 = vpop.eup %681  ;;  %612 = vmatpush1.bf16.msra.mxu0 %v611_v15 }
 0x190   :  { %v684_v24 = vpop.eup %683  ;;  %618 = vmatprep.subr.bf16.mxu1 %v617_v22 }
 0x191   :  { %v686_v25 = vpop.eup %685  ;;  %620 = vmatpush1.bf16.msra.mxu1 %v619_v20 }
 0x192   :  { %v688_v26 = vpop.eup %687 }
 0x193   :  { %v690_v27 = vpop.eup %689  ;;  %v615_v28 = vpack.c.bf16 %v688_v26, %v680_v21 }
 0x194   :  { %v692_v29 = vpop.eup %691  ;;  %v613_v30 = vpack.c.bf16 %v690_v27, %v682_v23 }
 0x195   :  { %v694_v31 = vpop.eup %693  ;;  %v623_v32 = vpack.c.bf16 %v692_v29, %v684_v24 }
 0x196   :  { %614 = vmatprep.subr.bf16.mxu0 %v613_v30  ;;  %v621_v33 = vpack.c.bf16 %v694_v31, %v686_v25 }
 0x197   :  { %616 = vmatpush1.bf16.msra.mxu0 %v615_v28 }
 0x198   :  { %622 = vmatprep.subr.bf16.mxu1 %v621_v33 }
 0x199   :  { %624 = vmatpush1.bf16.msra.mxu1 %v623_v32 }
 0x19a   :  { %591 = vmatmul.mubr.msk.f32.vlgmr.msra.gmra.mrb[8].mxu0 %vm179_vm0, %v386_v34 }
 0x19c   :  { %592 = vmatmul.mubr.msk.f32.vlgmr.msra.gmra.mrb[8].mxu1 %vm179_vm0, %v386_v34 }
 0x26d   :  { %v458_v39 = vpop.f32.mrb[8].mxu0 }
 0x26e   :  { %v459_v40 = vadd.f32 %v458_v39, %v388_v37  ;;  %v460_v41 = vpop.f32.mrb[9].mxu0 }
 0x26f   :  { %v529_v42 = vpop.f32.mrb[8].mxu1  ;;  %v461_v43 = vadd.f32 %v460_v41, %v388_v37 }
 0x270   :  { %v530_v45 = vadd.f32 %v529_v42, %v388_v37  ;;  %v531_v46 = vpop.f32.mrb[9].mxu1 }
 0x271   :  { %v538_v47 = vcombine.low %v459_v40, %v461_v43  ;;  %v532_v48 = vadd.f32 %v531_v46, %v388_v37 }
 0x273   :  { %v546_v49 = vrot.slane %v538_v47, %v545_v44  ;;  %v539_v50 = vcombine.low %v530_v45, %v532_v48 }
 0x275   :  { %v553_v13 = vrot.slane %v539_v50, %v545_v44 }
 0x277   :  { %v554_v51 = vcombine.low %v546_v49, %v553_v13 }
 0x279   :  { %v561_v52 = vrot.slane %v554_v51, %v545_v44 }
 0x27b   :  { %567 = vst.msk [vmem:[#allocation3] sm:$0xf] %vm565_vm1, %v561_v52 }
 0x27c   :  { %706 = shalt.err (!%p703_p4)
}
 0x27d   :  { %s707_s16 = scalar_lea.hbm %s871_s7, 64 }
 0x27e   :  { %p708_p5 = scmp.ne.s32.totalorder %s871_s7, %s707_s16  ;;  %p711_p6 = scmp.lt.u32.totalorder %s707_s16, %s871_s7 }
 0x280   :  { %p713_p7 = pnand %p711_p6, %p708_p5 }
 0x282   :  { %716 = shalt.err (!%p713_p7)
}
 0x283   :  { %577 = dma.vmem_to_hbm [thread:$0]  %s575_s13, 64, %s871_s7, [#allocation4]  }
 0x284   :  { %717 = dma.done.wait [#allocation4], 64  }
 0x285   :  { %718 = vsyncadd [#allocation4], 4294967232 }
 0x286   :  { %581 = vsyncpa [#allocation4], 1 }

</bundles_post_ra>
